<compile_context>
chip_gen: v7x
topology: tpu7x:2x2x1
jax: 0.10.0
libtpu: 0.0.40
codegen_flags: <defaults>
</compile_context>

<pallas_src>
import functools

import numpy as np
import jax
import jax.numpy as jnp
from jax import lax
from jax.experimental import pallas as pl
from jax.experimental.pallas import tpu as pltpu


_MASK_VALUE = -0.7 * float(np.finfo(np.float32).max)


def _round_up(x, m):
    return ((x + m - 1) // m) * m


def _vmem_limit_bytes():
    """~3/4 of physical VMEM: v5e/v6e (128 MiB) -> ~96 MiB, v7x (64 MiB) -> 48 MiB."""
    default = 48 * 1024 * 1024
    try:
        cap = int(pltpu.get_tpu_info().vmem_capacity_bytes)
    except Exception:
        return default
    return max(default, min((cap * 3) // 4, 100 * 1024 * 1024))


def _proj_kernel(x_ref, w_ref, b_ref, q_ref, k_ref, v_ref, *, d_head, mxu_dtype):
    """One (batch, seq-tile) step: fused Q|K|V projection, Q pre-scaled via weights."""
    x = x_ref[0].astype(mxu_dtype)                                  # (tp, D)
    qkv = jnp.dot(x, w_ref[...],
                  preferred_element_type=jnp.float32) + b_ref[...]  # (tp, 3*Dh) f32
    q_ref[0] = qkv[:, :d_head].astype(q_ref.dtype)
    k_ref[0] = qkv[:, d_head:2 * d_head].astype(k_ref.dtype)
    v_ref[0] = qkv[:, 2 * d_head:].astype(v_ref.dtype)


def _flash_kernel(q_ref, k_ref, v_ref, o_ref, m_sc, l_sc, acc_sc,
                  *, kv_tile, seq_len, mask_kv):
    """One (batch, q-tile, kv-tile) step of single-head flash attention."""
    ki = pl.program_id(2)

    @pl.when(ki == 0)
    def _init():
        m_sc[...] = jnp.full_like(m_sc, _MASK_VALUE)
        l_sc[...] = jnp.zeros_like(l_sc)
        acc_sc[...] = jnp.zeros_like(acc_sc)

    q = q_ref[0]                                                    # (tq, Dh), pre-scaled
    k = k_ref[0]                                                    # (tk, Dh)
    v = v_ref[0]                                                    # (tk, Dh)

    # scores = q @ k^T, contracting the last dims of both (no explicit transpose).
    s = lax.dot_general(q, k, dimension_numbers=(((1,), (1,)), ((), ())),
                        preferred_element_type=jnp.float32)         # (tq, tk) f32

    if mask_kv:  # static Python flag: only emitted when the sequence was padded
        key_idx = ki * kv_tile + lax.broadcasted_iota(jnp.int32, s.shape, 1)
        s = jnp.where(key_idx < seq_len, s, _MASK_VALUE)

    # Online softmax update (f32 state throughout).
    m_prev = m_sc[...]
    m_new = jnp.maximum(m_prev, jnp.max(s, axis=-1, keepdims=True))
    alpha = jnp.exp(m_prev - m_new)
    p = jnp.exp(s - m_new)
    l_sc[...] = alpha * l_sc[...] + jnp.sum(p, axis=-1, keepdims=True)
    acc_sc[...] = alpha * acc_sc[...] + jnp.dot(
        p.astype(v.dtype), v, preferred_element_type=jnp.float32)
    m_sc[...] = m_new

    @pl.when(ki == pl.num_programs(2) - 1)
    def _finalize():
        inv_l = pl.reciprocal(l_sc[...], approx=True)                # EUP vrcp
        o_ref[0] = (acc_sc[...] * inv_l).astype(o_ref.dtype)


def self_attention_head(x, wq, bq, wk, bk, wv, bv, d_model, n_heads, *,
                        q_block=1024, kv_block=512, mxu_dtype=jnp.bfloat16):
    """x: (B, S, d_model); weights: (d_model, d_head). Returns (B, S, d_head) in x.dtype."""
    B, S, D = x.shape
    assert D == d_model
    d_head = d_model // n_heads
    assert wq.shape == (D, d_head) and wk.shape == (D, d_head) and wv.shape == (D, d_head)

    # Sublane alignment: bf16 packs two rows per sublane -> multiples of 16 (f32: 8).
    align = 8 * (4 // np.dtype(mxu_dtype).itemsize)
    tk = min(_round_up(kv_block, align), _round_up(S, align))
    tq = min(_round_up(q_block, align), _round_up(S, tk))
    tq = max(tk, (tq // tk) * tk)            # keep tq a multiple of tk
    s_pad = _round_up(S, tq)                 # tk | tq | s_pad
    nq, nk = s_pad // tq, s_pad // tk
    mask_kv = s_pad != S

    scale = float(1.0 / np.sqrt(d_head))
    # Fold the softmax scale into Wq / bq (one-time, host side); fuse Q|K|V weights.
    w_qkv = jnp.concatenate([wq * scale, wk, wv], axis=1).astype(mxu_dtype)      # (D, 3*Dh)
    b_qkv = jnp.concatenate([bq * scale, bk, bv], axis=0)
    b_qkv = b_qkv.reshape(1, 3 * d_head).astype(jnp.float32)

    x_in = x.astype(mxu_dtype)
    if mask_kv:
        x_in = jnp.pad(x_in, ((0, 0), (0, s_pad - S), (0, 0)))

    vmem_limit = _vmem_limit_bytes()

    # ---- Stage 1: project Q (pre-scaled), K, V once into HBM (mxu_dtype). ----
    proj_kernel = functools.partial(_proj_kernel, d_head=d_head, mxu_dtype=mxu_dtype)
    qkv_shape = jax.ShapeDtypeStruct((B, s_pad, d_head), mxu_dtype)
    q_all, k_all, v_all = pl.pallas_call(
        proj_kernel,
        out_shape=(qkv_shape, qkv_shape, qkv_shape),
        grid_spec=pltpu.PrefetchScalarGridSpec(
            num_scalar_prefetch=0,
            grid=(B, nk),
            in_specs=[
                pl.BlockSpec((1, tk, D), lambda b, si: (b, si, 0)),       # x tile
                pl.BlockSpec((D, 3 * d_head), lambda b, si: (0, 0)),      # fused weights (resident)
                pl.BlockSpec((1, 3 * d_head), lambda b, si: (0, 0)),      # fused bias
            ],
            out_specs=[
                pl.BlockSpec((1, tk, d_head), lambda b, si: (b, si, 0)),  # Q (scaled)
                pl.BlockSpec((1, tk, d_head), lambda b, si: (b, si, 0)),  # K
                pl.BlockSpec((1, tk, d_head), lambda b, si: (b, si, 0)),  # V
            ],
        ),
        compiler_params=pltpu.CompilerParams(
            dimension_semantics=("parallel", "parallel"),
            vmem_limit_bytes=vmem_limit,
        ),
    )(x_in, w_qkv, b_qkv)

    # ---- Stage 2: flash attention over the pre-projected streams. ----
    flash_kernel = functools.partial(_flash_kernel, kv_tile=tk, seq_len=S, mask_kv=mask_kv)
    out = pl.pallas_call(
        flash_kernel,
        out_shape=jax.ShapeDtypeStruct((B, s_pad, d_head), x.dtype),
        grid_spec=pltpu.PrefetchScalarGridSpec(
            num_scalar_prefetch=0,
            grid=(B, nq, nk),
            in_specs=[
                pl.BlockSpec((1, tq, d_head), lambda b, qi, ki: (b, qi, 0)),   # Q (held across ki)
                pl.BlockSpec((1, tk, d_head), lambda b, qi, ki: (b, ki, 0)),   # K stream
                pl.BlockSpec((1, tk, d_head), lambda b, qi, ki: (b, ki, 0)),   # V stream
            ],
            out_specs=pl.BlockSpec((1, tq, d_head), lambda b, qi, ki: (b, qi, 0)),
            scratch_shapes=[
                pltpu.VMEM((tq, 1), jnp.float32),        # running max  m
                pltpu.VMEM((tq, 1), jnp.float32),        # running sum  l
                pltpu.VMEM((tq, d_head), jnp.float32),   # output accumulator
            ],
        ),
        compiler_params=pltpu.CompilerParams(
            dimension_semantics=("parallel", "parallel", "arbitrary"),
            vmem_limit_bytes=vmem_limit,
        ),
    )(q_all, k_all, v_all)

    if mask_kv:
        out = out[:, :S, :]
    return out


def _reference(x, wq, bq, wk, bk, wv, bv, d_model, n_heads):
    q = x @ wq + bq
    k = x @ wk + bk
    v = x @ wv + bv
    scores = jnp.einsum("bqd,bkd->bqk", q, k) / np.sqrt(d_model // n_heads)
    attn = jax.nn.softmax(scores, axis=-1)
    return jnp.einsum("bqk,bkd->bqd", attn, v)


if __name__ == "__main__":
    d_model = 32
    n_heads = 4
    d_head = d_model // n_heads
    B, S = 2, 8

    key = jax.random.PRNGKey(0)
    kx, kwq, kbq, kwk, kbk, kwv, kbv = jax.random.split(key, 7)

    x = jax.random.normal(kx, (B, S, d_model), dtype=jnp.float32)

    # Deterministic init mimicking nn.Linear's uniform(-1/sqrt(in), 1/sqrt(in)).
    bound = 1.0 / np.sqrt(d_model)
    wq = jax.random.uniform(kwq, (d_model, d_head), jnp.float32, -bound, bound)
    bq = jax.random.uniform(kbq, (d_head,), jnp.float32, -bound, bound)
    wk = jax.random.uniform(kwk, (d_model, d_head), jnp.float32, -bound, bound)
    bk = jax.random.uniform(kbk, (d_head,), jnp.float32, -bound, bound)
    wv = jax.random.uniform(kwv, (d_model, d_head), jnp.float32, -bound, bound)
    bv = jax.random.uniform(kbv, (d_head,), jnp.float32, -bound, bound)

    ref = _reference(x, wq, bq, wk, bk, wv, bv, d_model, n_heads)

    # f32 MXU path: only approximation is the EUP reciprocal.
    out_f32 = self_attention_head(x, wq, bq, wk, bk, wv, bv, d_model, n_heads,
                                  mxu_dtype=jnp.float32)
    out_f32 = jax.block_until_ready(out_f32)
    np.testing.assert_allclose(np.asarray(out_f32), np.asarray(ref),
                               rtol=2e-3, atol=2e-3)

    # bf16 MXU path (the default; also exercises the padded / masked-KV path).
    out_bf16 = self_attention_head(x, wq, bq, wk, bk, wv, bv, d_model, n_heads)
    out_bf16 = jax.block_until_ready(out_bf16)
    assert out_bf16.shape == (B, S, d_head)
    np.testing.assert_allclose(np.asarray(out_bf16), np.asarray(ref),
                               rtol=5e-2, atol=5e-2)

    print("KERNEL_OK")
</pallas_src>

<mosaic_0001>
module attributes {stable_mosaic.version = 11 : i64} {
  func.func @_proj_kernel(%arg0: i32, %arg1: i32, %arg2: memref<1x8x32xf32, #tpu.memory_space<vmem>>, %arg3: memref<32x24xf32, #tpu.memory_space<vmem>>, %arg4: memref<1x24xf32, #tpu.memory_space<vmem>>, %arg5: memref<1x8x8xf32, #tpu.memory_space<vmem>>, %arg6: memref<1x8x8xf32, #tpu.memory_space<vmem>>, %arg7: memref<1x8x8xf32, #tpu.memory_space<vmem>>) attributes {dimension_semantics = [#tpu.dimension_semantics<parallel>, #tpu.dimension_semantics<parallel>], iteration_bounds = array<i64: 2, 1>, scalar_prefetch = 0 : i64, scratch_operands = 0 : i64, tpu.core_type = #tpu.core_type<tc>, window_params = [{transform_indices = @transform_0, window_bounds = array<i64: 1, 8, 32>}, {pipeline_mode = #tpu.pipeline_mode<synchronous>, transform_indices = @transform_1, window_bounds = array<i64: 32, 24>}, {pipeline_mode = #tpu.pipeline_mode<synchronous>, transform_indices = @transform_2, window_bounds = array<i64: 1, 24>}, {transform_indices = @transform_3, window_bounds = array<i64: 1, 8, 8>}, {transform_indices = @transform_4, window_bounds = array<i64: 1, 8, 8>}, {transform_indices = @transform_5, window_bounds = array<i64: 1, 8, 8>}]} {
    %c0 = arith.constant 0 : index
    %c0_0 = arith.constant 0 : index
    %c0_1 = arith.constant 0 : index
    %0 = vector.load %arg2[%c0, %c0_0, %c0_1] : memref<1x8x32xf32, #tpu.memory_space<vmem>>, vector<1x8x32xf32>
    %1 = vector.shape_cast %0 : vector<1x8x32xf32> to vector<8x32xf32>
    %c0_2 = arith.constant 0 : index
    %c0_3 = arith.constant 0 : index
    %2 = vector.load %arg3[%c0_2, %c0_3] : memref<32x24xf32, #tpu.memory_space<vmem>>, vector<32x24xf32>
    %cst = arith.constant dense<0.000000e+00> : vector<8x24xf32>
    %3 = tpu.matmul %1, %2, %cst {dimension_numbers = #tpu.dot_dimension_numbers<[1], [0], [0], [1], [0, 0, 1, 1], [], []>} : vector<8x32xf32>, vector<32x24xf32>, vector<8x24xf32> -> vector<8x24xf32>
    %c0_4 = arith.constant 0 : index
    %c0_5 = arith.constant 0 : index
    %4 = vector.load %arg4[%c0_4, %c0_5] : memref<1x24xf32, #tpu.memory_space<vmem>>, vector<1x24xf32>
    %5 = vector.broadcast %4 : vector<1x24xf32> to vector<8x24xf32>
    %6 = arith.addf %3, %5 : vector<8x24xf32>
    %7 = vector.extract_strided_slice %6 {offsets = [0, 0], sizes = [8, 8], strides = [1, 1]} : vector<8x24xf32> to vector<8x8xf32>
    %c0_6 = arith.constant 0 : index
    %c0_7 = arith.constant 0 : index
    %c0_8 = arith.constant 0 : index
    %8 = vector.load %arg5[%c0_6, %c0_7, %c0_8] : memref<1x8x8xf32, #tpu.memory_space<vmem>>, vector<1x8x8xf32>
    %9 = vector.shape_cast %8 : vector<1x8x8xf32> to vector<8x8xf32>
    %10 = vector.shape_cast %7 : vector<8x8xf32> to vector<1x8x8xf32>
    tpu.vector_store %arg5[%c0_6, %c0_7, %c0_8], %10 {strides = array<i32>} : memref<1x8x8xf32, #tpu.memory_space<vmem>>, vector<1x8x8xf32>,
    %11 = vector.extract_strided_slice %6 {offsets = [0, 8], sizes = [8, 8], strides = [1, 1]} : vector<8x24xf32> to vector<8x8xf32>
    %c0_9 = arith.constant 0 : index
    %c0_10 = arith.constant 0 : index
    %c0_11 = arith.constant 0 : index
    %12 = vector.load %arg6[%c0_9, %c0_10, %c0_11] : memref<1x8x8xf32, #tpu.memory_space<vmem>>, vector<1x8x8xf32>
    %13 = vector.shape_cast %12 : vector<1x8x8xf32> to vector<8x8xf32>
    %14 = vector.shape_cast %11 : vector<8x8xf32> to vector<1x8x8xf32>
    tpu.vector_store %arg6[%c0_9, %c0_10, %c0_11], %14 {strides = array<i32>} : memref<1x8x8xf32, #tpu.memory_space<vmem>>, vector<1x8x8xf32>,
    %15 = vector.extract_strided_slice %6 {offsets = [0, 16], sizes = [8, 8], strides = [1, 1]} : vector<8x24xf32> to vector<8x8xf32>
    %c0_12 = arith.constant 0 : index
    %c0_13 = arith.constant 0 : index
    %c0_14 = arith.constant 0 : index
    %16 = vector.load %arg7[%c0_12, %c0_13, %c0_14] : memref<1x8x8xf32, #tpu.memory_space<vmem>>, vector<1x8x8xf32>
    %17 = vector.shape_cast %16 : vector<1x8x8xf32> to vector<8x8xf32>
    %18 = vector.shape_cast %15 : vector<8x8xf32> to vector<1x8x8xf32>
    tpu.vector_store %arg7[%c0_12, %c0_13, %c0_14], %18 {strides = array<i32>} : memref<1x8x8xf32, #tpu.memory_space<vmem>>, vector<1x8x8xf32>,
    return
  }
  func.func @transform_0(%arg0: i32, %arg1: i32) -> (i32, i32, i32) {
    %c0_i32 = arith.constant 0 : i32
    %c0_i32_0 = arith.constant 0 : i32
    return %arg0, %arg1, %c0_i32 : i32, i32, i32
  }
  func.func @transform_1(%arg0: i32, %arg1: i32) -> (i32, i32) {
    %c0_i32 = arith.constant 0 : i32
    %c0_i32_0 = arith.constant 0 : i32
    %c0_i32_1 = arith.constant 0 : i32
    return %c0_i32, %c0_i32_0 : i32, i32
  }
  func.func @transform_2(%arg0: i32, %arg1: i32) -> (i32, i32) {
    %c0_i32 = arith.constant 0 : i32
    %c0_i32_0 = arith.constant 0 : i32
    %c0_i32_1 = arith.constant 0 : i32
    return %c0_i32, %c0_i32_0 : i32, i32
  }
  func.func @transform_3(%arg0: i32, %arg1: i32) -> (i32, i32, i32) {
    %c0_i32 = arith.constant 0 : i32
    %c0_i32_0 = arith.constant 0 : i32
    return %arg0, %arg1, %c0_i32 : i32, i32, i32
  }
  func.func @transform_4(%arg0: i32, %arg1: i32) -> (i32, i32, i32) {
    %c0_i32 = arith.constant 0 : i32
    %c0_i32_0 = arith.constant 0 : i32
    return %arg0, %arg1, %c0_i32 : i32, i32, i32
  }
  func.func @transform_5(%arg0: i32, %arg1: i32) -> (i32, i32, i32) {
    %c0_i32 = arith.constant 0 : i32
    %c0_i32_0 = arith.constant 0 : i32
    return %arg0, %arg1, %c0_i32 : i32, i32, i32
  }
}

</mosaic_0001>

<bundles_post_ra>
// kernel: tpu_custom_call.1
= control target key start
LH: loop header
LB: loop body
LE: loop exit
PB: predicated region body
PF: predicated region fallthrough
CT: control target
= control target key end

     0   :  { %11 = vsyncpa [#allocation3], 0  ;;  %s1058_s0 = inlined_call_operand.vmem [shape: f32[2,8,32], index: 0, kind: input, shape index: {}]   ;;  %s1059_s1 = inlined_call_operand.vmem [shape: f32[32,24], index: 1, kind: input, shape index: {}]   ;;  %s1060_s2 = inlined_call_operand.vmem [shape: f32[1,24], index: 2, kind: input, shape index: {}]   ;;  %s1061_s3 = inlined_call_operand.hbm [shape: f32[2,8,8], index: 3, kind: output, shape index: {0}]   ;;  %s1062_s4 = inlined_call_operand.hbm [shape: f32[2,8,8], index: 4, kind: output, shape index: {1}]   ;;  %s1063_s5 = inlined_call_operand.hbm [shape: f32[2,8,8], index: 5, kind: output, shape index: {2}]  }
   0x1   :  { %13 = vsyncpa [#allocation3 + $0x1], 0 }
   0x2   :  { %14 = vsyncpa [#allocation5], 0 }
   0x3   :  { %16 = vsyncpa [#allocation5 + $0x1], 0  ;;  %s840_s18 = smov 0   ;;  %s842_s19 = smov 0  }
   0x4   :  { %s844_s20 = smov 0   ;;  %s846_s21 = smov 0  }
   0x5   :  { %s848_s22 = smov 0   ;;  %s850_s23 = smov 0  }
   0x6 LB: > { %s551_s24 = sadd.s32 4294967295, %s800_s23   ;;  %s1064_s25 = sadd.s32 4294967294, %s800_s23   ;;  %s800_s23 = sphi %s850_s23, %s22_s23   ;;  %s796_s22 = sphi %s848_s22, %s1072_s22   ;;  %s792_s21 = sphi %s846_s21, %s1071_s21   ;;  %s788_s20 = sphi %s844_s20, %s1070_s20   ;;  %s784_s19 = sphi %s842_s19, %s1069_s19   ;;  %s780_s18 = sphi %s840_s18, %s1068_s18  }
   0x7   : > { %s34_s26 = sadd.s32 1, %s796_s22  ;;  %s113_s27 = sadd.s32 1, %s788_s20 }
   0x8   : > { %p36_p0 = scmp.ge.s32.totalorder %s34_s26, 2  ;;  %p123_p1 = scmp.ne.s32.totalorder %s788_s20, %s784_s19 }
   0x9   : > { %p124_p2 = scmp.eq.s32.totalorder %s551_s24, 1  ;;  %p129_p3 = scmp.ne.s32.totalorder %s784_s19, %s780_s18 }
   0xa   : > { %s1074_s26 = smov (%p36_p0, %s34_s26), 0  ;;  %p130_p5 = scmp.eq.s32.totalorder %s1064_s25, 1 }
   0xb   : > { %p882_p4 = por %p124_p2, %p123_p1  ;;  %s108_s29 = ssub.s32 %s796_s22, %s1074_s26 }
   0xc   : > { %p555_p6 = scmp.ge.s32.totalorder %s800_s23, 1  ;;  %p111_p7 = scmp.eq.s32.totalorder %s108_s29, 0 }
   0xd   : > { %p891_p8 = por %p130_p5, %p129_p3  ;;  %p220_p9 = scmp.lt.s32.totalorder %s800_s23, 3 }
   0xe   : > { %s897_s6 = scalar_select %p111_p7, %s788_s20, %s113_s27  }
   0xf   : > { %p221_p10 = pnand %p555_p6, %p220_p9 }
  0x10   : > { %v268_v0 = vld [vmem:[%s1059_s1] sm:$0xff] (!%p221_p10)  ;;  %v269_v1 = vld [vmem:[%s1059_s1 + $0x8] sm:$0xff] (!%p221_p10)  ;;  %v270_v2 = vld [vmem:[%s1059_s1 + $0x10] sm:$0xff] (!%p221_p10)  ;;  %v802_v3 = vmov (!%p221_p10), 0.0|0.0   ;;  %vm803_vm0 = vmmov (!%p221_p10), 0   ;;  %v804_v6 = vmov (!%p221_p10), 0.0  }
  0x11   : > { %224 = sbr.rel (%p221_p10) target bundleno = 395 (0x18b), region = 32  ;;  %586 = vmatprep.subr.bf16.mxu0 (!%p221_p10), %v802_v3  ;;  %v587_v4 = vpack.c.bf16 (!%p221_p10), %v269_v1, %v268_v0  ;;  %v271_v5 = vld [vmem:[%s1059_s1 + $0x18] sm:$0xff] (!%p221_p10)  ;;  %583 = vmatprep.mubr.msk.f32.mxu0 (!%p221_p10), %vm803_vm0, %v804_v6  ;;  %p260_p11 = scmp.lt.s32.totalorder (!%p221_p10), %s792_s21, 1  ;;  %vm279_vm1 = vcmask (!%p221_p10), 261120   ;;  %v560_v9 = vld [vmem:[%s1060_s2] ss:$0 sm:$0xff] (!%p221_p10) }
  0x12   : > { %v590_v7 = vpack.c.bf16 (!%p221_p10), %v271_v5, %v270_v2  ;;  %s243_s7 = sand.u32 (!%p221_p10), 1, %s784_s19   ;;  %s923_s11 = sshll.u32 (!%p221_p10), %s792_s21, 7  ;;  %vm353_vm2 = vcmask (!%p221_p10), 64512  }
  0x13   : > { %588 = vmatpush3.bf16.msra.mxu0 (!%p221_p10), %v587_v4  ;;  %s917_s8 = sshll.u32 (!%p221_p10), %s243_s7, 3  ;;  %s805_s17 = smov (!%p221_p10), 120  }
  0x14   : > { %589 = vmatprep.subr.bf16.mxu0 (!%p221_p10), %v802_v3  ;;  %s245_s12 = scalar_lea.vmem (!%p221_p10), [#allocation2], %s917_s8 }
  0x15   : > { %s389_s13 = sshll.u32 (!%p221_p10), %s245_s12, 4  ;;  %s932_s13 = int_to_ptr.vmem [resolvable:$true] %s389_s13 }
  0x16   : > { %s662_s27 = scalar_lea.vmem (!%p221_p10), %s932_s13, 128 }
  0x17   : > { %591 = vmatpush3.bf16.msra.mxu0 (!%p221_p10), %v590_v7  ;;  %p663_p12 = scmp.ne.s32.totalorder (!%p221_p10), %s932_s13, %s662_s27 }
  0x18   : > { %s261_s15 = scalar_select %p260_p11, %s792_s21, 1 }
  0x19   : > { %s365_s21 = scalar_lea.sflag [#allocation3], %s243_s7  ;;  %p664_p13 = pnand %p663_p12, %p882_p4 }
  0x1a   : > { %s559_s16 = sshll.u32 %s261_s15, 3 }
  0x1b   : > { %s266_s29 = scalar_lea.vmem %s1058_s0, %s559_s16  ;;  %s930_s16 = scalar_lea.hbm %s1061_s3, %s923_s11 }
  0x1c   : > { %v267_v8 = vld [vmem:[%s266_s29] sm:$0xff]  ;;  %p665_p0 = pneg %p664_p13  ;;  %s806_s29 = smov [#allocation2]  }
  0x1d   : > { %584 = vmatmul.mubr.msk.f32.vlgmr.msra.gmra.mrb[0].mxu0 %vm279_vm1, %v267_v8  ;;  %s666_s9 = sshll.u32 %s806_s29, 4  ;;  %s667_s9 = int_to_ptr.vmem [resolvable:$false] %s666_s9 }
  0x1e   : > { %s668_s10 = scalar_lea.vmem %s667_s9, 256  ;;  %p669_p1 = scmp.lt.s32.totalorder %s932_s13, %s667_s9 }
  0x1f   : > { %p670_p2 = scmp.lt.s32.totalorder %s668_s10, %s662_s27 }
  0x21   : > { %p671_p3 = por %p670_p2, %p669_p1 }
  0x23   : > { %p672_p5 = pnand %p671_p3, %p665_p0 }
  0xf0   : > { %v349_v10 = vpop.f32.mrb[0].mxu0 }
  0xf1   : > { %v350_v11 = vadd.f32 %v560_v9, %v349_v10  ;;  %v585_v12 = vpop.f32.mrb[1].mxu0 }
  0xf3   : > { %356 = vrot.lane.b32.xlu0 %v350_v11, %s805_s17  ;;  %354 = vst.msk [vmem:[%s245_s12] sm:$0xff] %vm353_vm2, %v350_v11 }
  0xf4   : > { %675 = shalt.err (!%p672_p5)
}
  0xf5   : > { %s676_s7 = scalar_lea.hbm %s930_s16, 128  ;;  %s680_s15 = scalar_lea.hbm %s1061_s3, 256 }
  0xf6   : > { %p677_p6 = scmp.ne.s32.totalorder %s930_s16, %s676_s7  ;;  %p681_p10 = scmp.lt.u32.totalorder %s930_s16, %s1061_s3 }
  0xf7   : > { %p682_p11 = scmp.lt.u32.totalorder %s680_s15, %s676_s7  ;;  %p684_p13 = scmp.lt.u32.totalorder %s676_s7, %s930_s16 }
  0xf8   : > { %p678_p7 = pnand %p677_p6, %p882_p4 }
  0xf9   : > { %p683_p12 = por %p682_p11, %p681_p10 }
  0xfa   : > { %p679_p9 = pneg %p678_p7 }
  0xfb   : > { %p685_p0 = por %p684_p13, %p683_p12 }
  0xfd   : > { %p686_p1 = pnand %p685_p0, %p679_p9 }
  0xff   : > { %689 = shalt.err (!%p686_p1)
}
 0x100   : > { %592 = dma.vmem_to_hbm [thread:$0]  (%p882_p4), %s932_s13, 128, %s930_s16, %s365_s21  }
 0x101   : > { %s807_s27 = smov 112   ;;  %s958_s9 = sand.u32 1, %s551_s24  }
 0x102   : > { %360 = vrot.lane.b32.xlu0 %v350_v11, %s807_s27  ;;  %s252_s10 = scalar_lea.vmem [#allocation4], %s917_s8  ;;  %s965_s15 = scalar_lea.hbm %s1062_s4, %s923_s11 }
 0x103   : > { %s403_s7 = sshll.u32 %s252_s10, 4  ;;  %s259_s13 = scalar_lea.vmem [#allocation6], %s917_s8  ;;  %s967_s7 = int_to_ptr.vmem [resolvable:$true] %s403_s7 }
 0x104   : > { %s972_s16 = sshll.u32 %s259_s13, 4  ;;  %s370_s24 = scalar_lea.sflag [#allocation5], %s958_s9  ;;  %s1000_s16 = int_to_ptr.vmem [resolvable:$true] %s972_s16 }
 0x105   : > { %s690_s21 = scalar_lea.vmem %s967_s7, 128  ;;  %s808_s17 = smov [#allocation4]  }
 0x106   : > { %p691_p2 = scmp.ne.s32.totalorder %s967_s7, %s690_s21  ;;  %s694_s29 = sshll.u32 %s808_s17, 4  ;;  %s695_s29 = int_to_ptr.vmem [resolvable:$false] %s694_s29 }
 0x107   : > { %s696_s27 = scalar_lea.vmem %s695_s29, 256  ;;  %p697_p6 = scmp.lt.s32.totalorder %s967_s7, %s695_s29 }
 0x108   : > { %p692_p3 = pnand %p691_p2, %p882_p4  ;;  %p698_p7 = scmp.lt.s32.totalorder %s696_s27, %s690_s21 }
 0x10a   : > { %p693_p5 = pneg %p692_p3  ;;  %p699_p9 = por %p698_p7, %p697_p6 }
 0x10c   : > { %p700_p10 = pnand %p699_p9, %p693_p5 }
 0x165   : > { %v357_v13 = vpop.permute.xlu0 %356 }
 0x166   : > { %359 = vst.msk [vmem:[%s252_s10] sm:$0xff] %vm353_vm2, %v357_v13 }
 0x167   : > { %703 = shalt.err (!%p700_p10)
}
 0x168   : > { %s704_s10 = scalar_lea.hbm %s965_s15, 128  ;;  %s708_s17 = scalar_lea.hbm %s1062_s4, 256 }
 0x169   : > { %p705_p11 = scmp.ne.s32.totalorder %s965_s15, %s704_s10  ;;  %p709_p0 = scmp.lt.u32.totalorder %s965_s15, %s1062_s4 }
 0x16a   : > { %p710_p1 = scmp.lt.u32.totalorder %s708_s17, %s704_s10  ;;  %p712_p3 = scmp.lt.u32.totalorder %s704_s10, %s965_s15 }
 0x16b   : > { %p706_p12 = pnand %p705_p11, %p882_p4 }
 0x16c   : > { %p711_p2 = por %p710_p1, %p709_p0 }
 0x16d   : > { %p707_p13 = pneg %p706_p12 }
 0x16e   : > { %p713_p5 = por %p712_p3, %p711_p2 }
 0x170   : > { %p714_p6 = pnand %p713_p5, %p707_p13 }
 0x172   : > { %717 = shalt.err (!%p714_p6)
}
 0x173   : > { %593 = dma.vmem_to_hbm [thread:$0]  (%p882_p4), %s967_s7, 128, %s965_s15, %s370_s24  }
 0x174   : > { %s1006_s27 = scalar_lea.hbm %s1063_s5, %s923_s11  ;;  %v361_v14 = vpop.permute.xlu0 %360  ;;  %s718_s10 = scalar_lea.vmem %s1000_s16, 128 }
 0x175   : > { %363 = vst.msk [vmem:[%s259_s13] sm:$0xff] %vm353_vm2, %v361_v14  ;;  %p719_p7 = scmp.ne.s32.totalorder %s1000_s16, %s718_s10  ;;  %s809_s7 = smov [#allocation6]  }
 0x176   : > { %s722_s15 = sshll.u32 %s809_s7, 4  ;;  %s723_s15 = int_to_ptr.vmem [resolvable:$false] %s722_s15 }
 0x177   : > { %p720_p9 = pnand %p719_p7, %p882_p4  ;;  %s724_s12 = scalar_lea.vmem %s723_s15, 256 }
 0x178   : > { %p725_p11 = scmp.lt.s32.totalorder %s1000_s16, %s723_s15  ;;  %p726_p12 = scmp.lt.s32.totalorder %s724_s12, %s718_s10 }
 0x179   : > { %p721_p10 = pneg %p720_p9 }
 0x17a   : > { %p727_p13 = por %p726_p12, %p725_p11 }
 0x17c   : > { %p728_p0 = pnand %p727_p13, %p721_p10 }
 0x17e   : > { %731 = shalt.err (!%p728_p0)
}
 0x17f   : > { %s732_s8 = scalar_lea.hbm %s1006_s27, 128  ;;  %s736_s14 = scalar_lea.hbm %s1063_s5, 256 }
 0x180   : > { %p733_p1 = scmp.ne.s32.totalorder %s1006_s27, %s732_s8  ;;  %p737_p5 = scmp.lt.u32.totalorder %s1006_s27, %s1063_s5 }
 0x181   : > { %p738_p6 = scmp.lt.u32.totalorder %s736_s14, %s732_s8  ;;  %p740_p9 = scmp.lt.u32.totalorder %s732_s8, %s1006_s27 }
 0x182   : > { %p734_p2 = pnand %p733_p1, %p882_p4 }
 0x183   : > { %p739_p7 = por %p738_p6, %p737_p5 }
 0x184   : > { %p735_p3 = pneg %p734_p2 }
 0x185   : > { %p741_p10 = por %p740_p9, %p739_p7 }
 0x187   : > { %p742_p11 = pnand %p741_p10, %p735_p3 }
 0x189   : > { %745 = shalt.err (!%p742_p11)
}
 0x18a   : > { %594 = dma.vmem_to_hbm [thread:$0]  (%p882_p4), %s1000_s16, 128, %s1006_s27, %s370_s24  }
 0x18b PF: > { %p608_p12 = scmp.ge.s32.totalorder %s800_s23, 2  ;;  %s429_s25 = sand.u32 1, %s780_s18  }
 0x18c   : > { %s430_s21 = scalar_lea.sflag [#allocation3], %s429_s25 }
 0x18d   : > { %p599_p13 = pnand %p608_p12, %p891_p8 }
 0x18f   : > { %771 = dma.done.wait (!%p599_p13), %s430_s21, 128  }
 0x190   : > { %773 = vsyncadd (!%p599_p13), %s430_s21, 4294967168  ;;  %s1067_s10 = sadd.s32 4294967294, %s800_s23  }
 0x191   : > { %s438_s7 = sand.u32 1, %s1067_s10  }
 0x192   : > { %s439_s28 = scalar_lea.sflag [#allocation5], %s438_s7 }
 0x193   : > { %775 = dma.done.wait (!%p599_p13), %s439_s28, 256  }
 0x194   : > { %777 = vsyncadd (!%p599_p13), %s439_s28, 4294967040  ;;  %s22_s23 = sadd.s32 1, %s800_s23   ;;  %s1068_s18 = smov %s784_s19 }
 0x195   : > { %p19_p4 = scmp.ge.s32.totalorder %s22_s23, 4   ;;  %s1069_s19 = smov %s788_s20 }
 0x196   : > { %s1070_s20 = smov %s897_s6  ;;  %s1071_s21 = smov %s796_s22 }
 0x197   : > { %s1072_s22 = smov %s1074_s26  ;;  %21 = sbr.rel (!%p19_p4) target bundleno = 6 (0x6), region = 99 }
 0x19e   :  { %453 = vsyncpa [#allocation3], 1 }
 0x19f   :  { %455 = vsyncpa [#allocation3 + $0x1], 1 }
 0x1a0   :  { %456 = vsyncpa [#allocation5], 1 }
 0x1a1   :  { %458 = vsyncpa [#allocation5 + $0x1], 1 }

</bundles_post_ra>
